<compile_context>
chip_gen: v5e
topology: v5e:2x2
jax: 0.10.0
libtpu: 0.0.40
codegen_flags: <defaults>
</compile_context>

<pallas_src>
import math

import jax
import jax.numpy as jnp
from jax.experimental import pallas as pl
from jax.experimental.pallas import tpu as pltpu

NEG_SLOPE = 0.01  # PyTorch LeakyReLU default
LOG_2PI = math.log(2.0 * math.pi)


def _likelihood_kernel(xp_ref, x_ref, eps_ref, wmu_ref, wlv_ref, bmu_ref, blv_ref,
                       ll_ref, samp_ref, mean_ref, var_ref, scale_ref):
    # xp_ref:  (1, C_in,  THW)  activation input tile (HW on lanes)
    # x_ref:   (1, C_out, THW)  target tile for log-likelihood
    # eps_ref: (1, C_out, THW)  standard-normal noise tile for rsample
    # wmu/wlv: (C_in, C_out) in SMEM;  bmu/blv: (C_out,) in SMEM
    c_in = xp_ref.shape[1]
    c_out = x_ref.shape[1]

    xp = xp_ref[0]                                       # (C_in, THW)
    a = jnp.where(xp > 0, xp, NEG_SLOPE * xp)            # LeakyReLU (self.activation)

    # 1x1 conv == per-pixel channel mix.  C_in/C_out are tiny -> unrolled VPU
    # FMAs with SMEM scalar weights instead of a (massively padded) MXU matmul.
    mu_rows, lv_rows = [], []
    for co in range(c_out):
        mu = a[0:1, :] * wmu_ref[0, co]
        lv = a[0:1, :] * wlv_ref[0, co]
        for ci in range(1, c_in):
            mu = mu + a[ci:ci + 1, :] * wmu_ref[ci, co]
            lv = lv + a[ci:ci + 1, :] * wlv_ref[ci, co]
        mu_rows.append(mu + bmu_ref[co])
        lv_rows.append(lv + blv_ref[co])
    mu = jnp.concatenate(mu_rows, axis=0)                # (C_out, THW)
    lv = jnp.concatenate(lv_rows, axis=0)                # (C_out, THW)

    scale = jnp.exp(0.5 * lv)
    inv_var = jnp.exp(-lv)                               # avoids per-element divide
    var = scale * scale

    # Normal log_prob(x) -> per-(batch, HW-tile) partial sum (reduced in wrapper)
    d = x_ref[0] - mu
    logp = -0.5 * (d * d) * inv_var - 0.5 * lv - 0.5 * LOG_2PI
    ll_ref[...] = jnp.sum(logp).reshape(1, 1, 1)

    # rsample (reparameterized), mean, variance, scale
    samp_ref[0] = mu + scale * eps_ref[0]
    mean_ref[0] = mu
    var_ref[0] = var
    scale_ref[0] = scale


def _pick_tile_hw(hw, max_tile=4096):
    """Largest multiple-of-128 divisor of hw that is <= max_tile (VMEM-friendly
    on v7x's 64 MiB as well); falls back to the full extent if none exists."""
    best = None
    cand = 128
    while cand <= min(hw, max_tile):
        if hw % cand == 0:
            best = cand
        cand += 128
    return best if best is not None else hw


def likelihood_forward(x_p_nchw, x_nchw, eps_nchw, w_mu, w_lv, b_mu, b_lv,
                       tile_hw=None):
    B, C_in, H, W = x_p_nchw.shape
    C_out = w_mu.shape[1]
    HW = H * W
    if tile_hw is None:
        tile_hw = _pick_tile_hw(HW)
    assert HW % tile_hw == 0, "tile_hw must divide H*W"
    NT = HW // tile_hw

    # Free reshapes (no transpose): NCHW -> (B, C, HW); channels on sublanes,
    # HW on lanes.
    xp = x_p_nchw.reshape(B, C_in, HW).astype(jnp.float32)
    x = x_nchw.reshape(B, C_out, HW).astype(jnp.float32)
    # TODO(synk): eps could be generated in-kernel with pltpu.prng_seed /
    # prng_random_bits to drop one full HBM input stream; kept as an input for
    # exact RNG parity with the reference.
    eps = eps_nchw.reshape(B, C_out, HW).astype(jnp.float32)

    out_shapes = (
        jax.ShapeDtypeStruct((B * NT, 1, 1), jnp.float32),   # LL partials
        jax.ShapeDtypeStruct((B, C_out, HW), jnp.float32),   # samples
        jax.ShapeDtypeStruct((B, C_out, HW), jnp.float32),   # mean
        jax.ShapeDtypeStruct((B, C_out, HW), jnp.float32),   # variance
        jax.ShapeDtypeStruct((B, C_out, HW), jnp.float32),   # scale
    )

    def img_spec(c):
        return pl.BlockSpec((1, c, tile_hw), lambda b, t: (b, 0, t))

    smem_spec = pl.BlockSpec(memory_space=pltpu.SMEM)

    grid_spec = pltpu.PrefetchScalarGridSpec(
        num_scalar_prefetch=0,
        grid=(B, NT),
        in_specs=[
            img_spec(C_in),    # x_p
            img_spec(C_out),   # x
            img_spec(C_out),   # eps
            smem_spec, smem_spec, smem_spec, smem_spec,   # w_mu, w_lv, b_mu, b_lv
        ],
        out_specs=[
            pl.BlockSpec((1, 1, 1), lambda b, t: (b * NT + t, 0, 0)),
            img_spec(C_out), img_spec(C_out), img_spec(C_out), img_spec(C_out),
        ],
    )

    ll_part, samp, mean, var, scale = pl.pallas_call(
        _likelihood_kernel,
        out_shape=out_shapes,
        grid_spec=grid_spec,
        compiler_params=pltpu.CompilerParams(
            dimension_semantics=("parallel", "parallel")),
    )(xp, x, eps,
      w_mu.astype(jnp.float32), w_lv.astype(jnp.float32),
      b_mu.astype(jnp.float32), b_lv.astype(jnp.float32))

    likelihood = jnp.sum(ll_part.reshape(B, NT), axis=1)

    to_nchw = lambda t: t.reshape(B, C_out, H, W)   # free reshape (no transpose)
    mean_nchw = to_nchw(mean)
    data = {
        "likelihood": likelihood,
        "samples": to_nchw(samp),
        "mean": mean_nchw,
        "mode": None,            # LikelihoodModule.mode returns None
        "variance": to_nchw(var),
        "distribution": None,
        "distribution_kwargs": {"loc": mean_nchw, "scale": to_nchw(scale)},
    }
    return likelihood, data


def _reference(x_p, x, eps, w_mu, w_lv, b_mu, b_lv):
    # Pure-JAX reference (NCHW) for numerical verification of the kernel.
    a = jnp.where(x_p > 0, x_p, NEG_SLOPE * x_p)
    mu = jnp.einsum("bchw,cd->bdhw", a, w_mu) + b_mu[None, :, None, None]
    lv = jnp.einsum("bchw,cd->bdhw", a, w_lv) + b_lv[None, :, None, None]
    scale = jnp.exp(0.5 * lv)
    z = (x - mu) / scale
    logp = -0.5 * z * z - 0.5 * lv - 0.5 * LOG_2PI
    ll = jnp.sum(logp.reshape(x.shape[0], -1), axis=-1)
    samp = mu + scale * eps
    return ll, samp, mu, scale * scale, scale


if __name__ == "__main__":
    B, C_in, C_out, H, W = 2, 4, 3, 16, 16
    key = jax.random.PRNGKey(0)
    k1, k2, k3, k4, k5, k6, k7 = jax.random.split(key, 7)

    x_p = jax.random.normal(k1, (B, C_in, H, W), jnp.float32)
    x = jax.random.normal(k2, (B, C_out, H, W), jnp.float32)
    eps = jax.random.normal(k3, (B, C_out, H, W), jnp.float32)

    # Deterministic 1x1-conv parameter net (mu head and log-var head).
    w_mu = 0.1 * jax.random.normal(k4, (C_in, C_out), jnp.float32)
    w_lv = 0.1 * jax.random.normal(k5, (C_in, C_out), jnp.float32)
    b_mu = 0.1 * jax.random.normal(k6, (C_out,), jnp.float32)
    b_lv = 0.1 * jax.random.normal(k7, (C_out,), jnp.float32)

    # tile_hw=128 forces the multi-tile HW-grid path (grid = (B=2, NT=2)).
    likelihood, data = likelihood_forward(x_p, x, eps, w_mu, w_lv, b_mu, b_lv,
                                          tile_hw=128)
    jax.block_until_ready(likelihood)
    jax.block_until_ready(data["samples"])

    # Verify against pure-JAX reference.
    ll_ref, samp_ref, mean_ref, var_ref, scale_ref = _reference(
        x_p, x, eps, w_mu, w_lv, b_mu, b_lv)
    assert jnp.allclose(likelihood, ll_ref, rtol=1e-4, atol=1e-3)
    assert jnp.allclose(data["samples"], samp_ref, rtol=1e-5, atol=1e-5)
    assert jnp.allclose(data["mean"], mean_ref, rtol=1e-5, atol=1e-5)
    assert jnp.allclose(data["variance"], var_ref, rtol=1e-5, atol=1e-5)
    assert jnp.allclose(data["distribution_kwargs"]["scale"], scale_ref,
                        rtol=1e-5, atol=1e-5)

    print("KERNEL_OK")
</pallas_src>

<mosaic_0001>
module attributes {stable_mosaic.version = 11 : i64} {
  func.func @_likelihood_kernel(%arg0: i32, %arg1: i32, %arg2: memref<1x4x128xf32, #tpu.memory_space<vmem>>, %arg3: memref<1x3x128xf32, #tpu.memory_space<vmem>>, %arg4: memref<1x3x128xf32, #tpu.memory_space<vmem>>, %arg5: memref<4x3xf32, #tpu.memory_space<smem>>, %arg6: memref<4x3xf32, #tpu.memory_space<smem>>, %arg7: memref<3xf32, #tpu.memory_space<smem>>, %arg8: memref<3xf32, #tpu.memory_space<smem>>, %arg9: memref<1x1x1xf32, #tpu.memory_space<vmem>>, %arg10: memref<1x3x128xf32, #tpu.memory_space<vmem>>, %arg11: memref<1x3x128xf32, #tpu.memory_space<vmem>>, %arg12: memref<1x3x128xf32, #tpu.memory_space<vmem>>, %arg13: memref<1x3x128xf32, #tpu.memory_space<vmem>>) attributes {dimension_semantics = [#tpu.dimension_semantics<parallel>, #tpu.dimension_semantics<parallel>], iteration_bounds = array<i64: 2, 2>, scalar_prefetch = 0 : i64, scratch_operands = 0 : i64, tpu.core_type = #tpu.core_type<tc>, window_params = [{transform_indices = @transform_0, window_bounds = array<i64: 1, 4, 128>}, {transform_indices = @transform_1, window_bounds = array<i64: 1, 3, 128>}, {transform_indices = @transform_2, window_bounds = array<i64: 1, 3, 128>}, {transform_indices = @transform_3, window_bounds = array<i64: 4, 3>}, {transform_indices = @transform_4, window_bounds = array<i64: 4, 3>}, {transform_indices = @transform_5, window_bounds = array<i64: 3>}, {transform_indices = @transform_6, window_bounds = array<i64: 3>}, {transform_indices = @transform_7, window_bounds = array<i64: 1, 1, 1>}, {transform_indices = @transform_8, window_bounds = array<i64: 1, 3, 128>}, {transform_indices = @transform_9, window_bounds = array<i64: 1, 3, 128>}, {transform_indices = @transform_10, window_bounds = array<i64: 1, 3, 128>}, {transform_indices = @transform_11, window_bounds = array<i64: 1, 3, 128>}]} {
    %c0 = arith.constant 0 : index
    %c0_0 = arith.constant 0 : index
    %c0_1 = arith.constant 0 : index
    %0 = vector.load %arg2[%c0, %c0_0, %c0_1] : memref<1x4x128xf32, #tpu.memory_space<vmem>>, vector<1x4x128xf32>
    %1 = vector.shape_cast %0 : vector<1x4x128xf32> to vector<4x128xf32>
    %cst = arith.constant 0.000000e+00 : f32
    %2 = vector.broadcast %cst : f32 to vector<4x128xf32>
    %3 = arith.cmpf ogt, %1, %2 : vector<4x128xf32>
    %cst_2 = arith.constant 0.00999999977 : f32
    %4 = vector.broadcast %cst_2 : f32 to vector<4x128xf32>
    %5 = arith.mulf %4, %1 : vector<4x128xf32>
    %6 = arith.select %3, %1, %5 : vector<4x128xi1>, vector<4x128xf32>
    %7 = vector.extract_strided_slice %6 {offsets = [0, 0], sizes = [1, 128], strides = [1, 1]} : vector<4x128xf32> to vector<1x128xf32>
    %c0_3 = arith.constant 0 : index
    %c0_4 = arith.constant 0 : index
    %8 = memref.load %arg5[%c0_3, %c0_4] : memref<4x3xf32, #tpu.memory_space<smem>>
    %9 = vector.broadcast %8 : f32 to vector<1x128xf32>
    %10 = arith.mulf %7, %9 : vector<1x128xf32>
    %11 = vector.extract_strided_slice %6 {offsets = [0, 0], sizes = [1, 128], strides = [1, 1]} : vector<4x128xf32> to vector<1x128xf32>
    %c0_5 = arith.constant 0 : index
    %c0_6 = arith.constant 0 : index
    %12 = memref.load %arg6[%c0_5, %c0_6] : memref<4x3xf32, #tpu.memory_space<smem>>
    %13 = vector.broadcast %12 : f32 to vector<1x128xf32>
    %14 = arith.mulf %11, %13 : vector<1x128xf32>
    %15 = vector.extract_strided_slice %6 {offsets = [1, 0], sizes = [1, 128], strides = [1, 1]} : vector<4x128xf32> to vector<1x128xf32>
    %c1 = arith.constant 1 : index
    %c0_7 = arith.constant 0 : index
    %16 = memref.load %arg5[%c1, %c0_7] : memref<4x3xf32, #tpu.memory_space<smem>>
    %17 = vector.broadcast %16 : f32 to vector<1x128xf32>
    %18 = arith.mulf %15, %17 : vector<1x128xf32>
    %19 = arith.addf %10, %18 : vector<1x128xf32>
    %20 = vector.extract_strided_slice %6 {offsets = [1, 0], sizes = [1, 128], strides = [1, 1]} : vector<4x128xf32> to vector<1x128xf32>
    %c1_8 = arith.constant 1 : index
    %c0_9 = arith.constant 0 : index
    %21 = memref.load %arg6[%c1_8, %c0_9] : memref<4x3xf32, #tpu.memory_space<smem>>
    %22 = vector.broadcast %21 : f32 to vector<1x128xf32>
    %23 = arith.mulf %20, %22 : vector<1x128xf32>
    %24 = arith.addf %14, %23 : vector<1x128xf32>
    %25 = vector.extract_strided_slice %6 {offsets = [2, 0], sizes = [1, 128], strides = [1, 1]} : vector<4x128xf32> to vector<1x128xf32>
    %c2 = arith.constant 2 : index
    %c0_10 = arith.constant 0 : index
    %26 = memref.load %arg5[%c2, %c0_10] : memref<4x3xf32, #tpu.memory_space<smem>>
    %27 = vector.broadcast %26 : f32 to vector<1x128xf32>
    %28 = arith.mulf %25, %27 : vector<1x128xf32>
    %29 = arith.addf %19, %28 : vector<1x128xf32>
    %30 = vector.extract_strided_slice %6 {offsets = [2, 0], sizes = [1, 128], strides = [1, 1]} : vector<4x128xf32> to vector<1x128xf32>
    %c2_11 = arith.constant 2 : index
    %c0_12 = arith.constant 0 : index
    %31 = memref.load %arg6[%c2_11, %c0_12] : memref<4x3xf32, #tpu.memory_space<smem>>
    %32 = vector.broadcast %31 : f32 to vector<1x128xf32>
    %33 = arith.mulf %30, %32 : vector<1x128xf32>
    %34 = arith.addf %24, %33 : vector<1x128xf32>
    %35 = vector.extract_strided_slice %6 {offsets = [3, 0], sizes = [1, 128], strides = [1, 1]} : vector<4x128xf32> to vector<1x128xf32>
    %c3 = arith.constant 3 : index
    %c0_13 = arith.constant 0 : index
    %36 = memref.load %arg5[%c3, %c0_13] : memref<4x3xf32, #tpu.memory_space<smem>>
    %37 = vector.broadcast %36 : f32 to vector<1x128xf32>
    %38 = arith.mulf %35, %37 : vector<1x128xf32>
    %39 = arith.addf %29, %38 : vector<1x128xf32>
    %40 = vector.extract_strided_slice %6 {offsets = [3, 0], sizes = [1, 128], strides = [1, 1]} : vector<4x128xf32> to vector<1x128xf32>
    %c3_14 = arith.constant 3 : index
    %c0_15 = arith.constant 0 : index
    %41 = memref.load %arg6[%c3_14, %c0_15] : memref<4x3xf32, #tpu.memory_space<smem>>
    %42 = vector.broadcast %41 : f32 to vector<1x128xf32>
    %43 = arith.mulf %40, %42 : vector<1x128xf32>
    %44 = arith.addf %34, %43 : vector<1x128xf32>
    %c0_16 = arith.constant 0 : index
    %45 = memref.load %arg7[%c0_16] : memref<3xf32, #tpu.memory_space<smem>>
    %46 = vector.broadcast %45 : f32 to vector<1x128xf32>
    %47 = arith.addf %39, %46 : vector<1x128xf32>
    %c0_17 = arith.constant 0 : index
    %48 = memref.load %arg8[%c0_17] : memref<3xf32, #tpu.memory_space<smem>>
    %49 = vector.broadcast %48 : f32 to vector<1x128xf32>
    %50 = arith.addf %44, %49 : vector<1x128xf32>
    %51 = vector.extract_strided_slice %6 {offsets = [0, 0], sizes = [1, 128], strides = [1, 1]} : vector<4x128xf32> to vector<1x128xf32>
    %c0_18 = arith.constant 0 : index
    %c1_19 = arith.constant 1 : index
    %52 = memref.load %arg5[%c0_18, %c1_19] : memref<4x3xf32, #tpu.memory_space<smem>>
    %53 = vector.broadcast %52 : f32 to vector<1x128xf32>
    %54 = arith.mulf %51, %53 : vector<1x128xf32>
    %55 = vector.extract_strided_slice %6 {offsets = [0, 0], sizes = [1, 128], strides = [1, 1]} : vector<4x128xf32> to vector<1x128xf32>
    %c0_20 = arith.constant 0 : index
    %c1_21 = arith.constant 1 : index
    %56 = memref.load %arg6[%c0_20, %c1_21] : memref<4x3xf32, #tpu.memory_space<smem>>
    %57 = vector.broadcast %56 : f32 to vector<1x128xf32>
    %58 = arith.mulf %55, %57 : vector<1x128xf32>
    %59 = vector.extract_strided_slice %6 {offsets = [1, 0], sizes = [1, 128], strides = [1, 1]} : vector<4x128xf32> to vector<1x128xf32>
    %c1_22 = arith.constant 1 : index
    %c1_23 = arith.constant 1 : index
    %60 = memref.load %arg5[%c1_22, %c1_23] : memref<4x3xf32, #tpu.memory_space<smem>>
    %61 = vector.broadcast %60 : f32 to vector<1x128xf32>
    %62 = arith.mulf %59, %61 : vector<1x128xf32>
    %63 = arith.addf %54, %62 : vector<1x128xf32>
    %64 = vector.extract_strided_slice %6 {offsets = [1, 0], sizes = [1, 128], strides = [1, 1]} : vector<4x128xf32> to vector<1x128xf32>
    %c1_24 = arith.constant 1 : index
    %c1_25 = arith.constant 1 : index
    %65 = memref.load %arg6[%c1_24, %c1_25] : memref<4x3xf32, #tpu.memory_space<smem>>
    %66 = vector.broadcast %65 : f32 to vector<1x128xf32>
    %67 = arith.mulf %64, %66 : vector<1x128xf32>
    %68 = arith.addf %58, %67 : vector<1x128xf32>
    %69 = vector.extract_strided_slice %6 {offsets = [2, 0], sizes = [1, 128], strides = [1, 1]} : vector<4x128xf32> to vector<1x128xf32>
    %c2_26 = arith.constant 2 : index
    %c1_27 = arith.constant 1 : index
    %70 = memref.load %arg5[%c2_26, %c1_27] : memref<4x3xf32, #tpu.memory_space<smem>>
    %71 = vector.broadcast %70 : f32 to vector<1x128xf32>
    %72 = arith.mulf %69, %71 : vector<1x128xf32>
    %73 = arith.addf %63, %72 : vector<1x128xf32>
    %74 = vector.extract_strided_slice %6 {offsets = [2, 0], sizes = [1, 128], strides = [1, 1]} : vector<4x128xf32> to vector<1x128xf32>
    %c2_28 = arith.constant 2 : index
    %c1_29 = arith.constant 1 : index
    %75 = memref.load %arg6[%c2_28, %c1_29] : memref<4x3xf32, #tpu.memory_space<smem>>
    %76 = vector.broadcast %75 : f32 to vector<1x128xf32>
    %77 = arith.mulf %74, %76 : vector<1x128xf32>
    %78 = arith.addf %68, %77 : vector<1x128xf32>
    %79 = vector.extract_strided_slice %6 {offsets = [3, 0], sizes = [1, 128], strides = [1, 1]} : vector<4x128xf32> to vector<1x128xf32>
    %c3_30 = arith.constant 3 : index
    %c1_31 = arith.constant 1 : index
    %80 = memref.load %arg5[%c3_30, %c1_31] : memref<4x3xf32, #tpu.memory_space<smem>>
    %81 = vector.broadcast %80 : f32 to vector<1x128xf32>
    %82 = arith.mulf %79, %81 : vector<1x128xf32>
    %83 = arith.addf %73, %82 : vector<1x128xf32>
    %84 = vector.extract_strided_slice %6 {offsets = [3, 0], sizes = [1, 128], strides = [1, 1]} : vector<4x128xf32> to vector<1x128xf32>
    %c3_32 = arith.constant 3 : index
    %c1_33 = arith.constant 1 : index
    %85 = memref.load %arg6[%c3_32, %c1_33] : memref<4x3xf32, #tpu.memory_space<smem>>
    %86 = vector.broadcast %85 : f32 to vector<1x128xf32>
    %87 = arith.mulf %84, %86 : vector<1x128xf32>
    %88 = arith.addf %78, %87 : vector<1x128xf32>
    %c1_34 = arith.constant 1 : index
    %89 = memref.load %arg7[%c1_34] : memref<3xf32, #tpu.memory_space<smem>>
    %90 = vector.broadcast %89 : f32 to vector<1x128xf32>
    %91 = arith.addf %83, %90 : vector<1x128xf32>
    %c1_35 = arith.constant 1 : index
    %92 = memref.load %arg8[%c1_35] : memref<3xf32, #tpu.memory_space<smem>>
    %93 = vector.broadcast %92 : f32 to vector<1x128xf32>
    %94 = arith.addf %88, %93 : vector<1x128xf32>
    %95 = vector.extract_strided_slice %6 {offsets = [0, 0], sizes = [1, 128], strides = [1, 1]} : vector<4x128xf32> to vector<1x128xf32>
    %c0_36 = arith.constant 0 : index
    %c2_37 = arith.constant 2 : index
    %96 = memref.load %arg5[%c0_36, %c2_37] : memref<4x3xf32, #tpu.memory_space<smem>>
    %97 = vector.broadcast %96 : f32 to vector<1x128xf32>
    %98 = arith.mulf %95, %97 : vector<1x128xf32>
    %99 = vector.extract_strided_slice %6 {offsets = [0, 0], sizes = [1, 128], strides = [1, 1]} : vector<4x128xf32> to vector<1x128xf32>
    %c0_38 = arith.constant 0 : index
    %c2_39 = arith.constant 2 : index
    %100 = memref.load %arg6[%c0_38, %c2_39] : memref<4x3xf32, #tpu.memory_space<smem>>
    %101 = vector.broadcast %100 : f32 to vector<1x128xf32>
    %102 = arith.mulf %99, %101 : vector<1x128xf32>
    %103 = vector.extract_strided_slice %6 {offsets = [1, 0], sizes = [1, 128], strides = [1, 1]} : vector<4x128xf32> to vector<1x128xf32>
    %c1_40 = arith.constant 1 : index
    %c2_41 = arith.constant 2 : index
    %104 = memref.load %arg5[%c1_40, %c2_41] : memref<4x3xf32, #tpu.memory_space<smem>>
    %105 = vector.broadcast %104 : f32 to vector<1x128xf32>
    %106 = arith.mulf %103, %105 : vector<1x128xf32>
    %107 = arith.addf %98, %106 : vector<1x128xf32>
    %108 = vector.extract_strided_slice %6 {offsets = [1, 0], sizes = [1, 128], strides = [1, 1]} : vector<4x128xf32> to vector<1x128xf32>
    %c1_42 = arith.constant 1 : index
    %c2_43 = arith.constant 2 : index
    %109 = memref.load %arg6[%c1_42, %c2_43] : memref<4x3xf32, #tpu.memory_space<smem>>
    %110 = vector.broadcast %109 : f32 to vector<1x128xf32>
    %111 = arith.mulf %108, %110 : vector<1x128xf32>
    %112 = arith.addf %102, %111 : vector<1x128xf32>
    %113 = vector.extract_strided_slice %6 {offsets = [2, 0], sizes = [1, 128], strides = [1, 1]} : vector<4x128xf32> to vector<1x128xf32>
    %c2_44 = arith.constant 2 : index
    %c2_45 = arith.constant 2 : index
    %114 = memref.load %arg5[%c2_44, %c2_45] : memref<4x3xf32, #tpu.memory_space<smem>>
    %115 = vector.broadcast %114 : f32 to vector<1x128xf32>
    %116 = arith.mulf %113, %115 : vector<1x128xf32>
    %117 = arith.addf %107, %116 : vector<1x128xf32>
    %118 = vector.extract_strided_slice %6 {offsets = [2, 0], sizes = [1, 128], strides = [1, 1]} : vector<4x128xf32> to vector<1x128xf32>
    %c2_46 = arith.constant 2 : index
    %c2_47 = arith.constant 2 : index
    %119 = memref.load %arg6[%c2_46, %c2_47] : memref<4x3xf32, #tpu.memory_space<smem>>
    %120 = vector.broadcast %119 : f32 to vector<1x128xf32>
    %121 = arith.mulf %118, %120 : vector<1x128xf32>
    %122 = arith.addf %112, %121 : vector<1x128xf32>
    %123 = vector.extract_strided_slice %6 {offsets = [3, 0], sizes = [1, 128], strides = [1, 1]} : vector<4x128xf32> to vector<1x128xf32>
    %c3_48 = arith.constant 3 : index
    %c2_49 = arith.constant 2 : index
    %124 = memref.load %arg5[%c3_48, %c2_49] : memref<4x3xf32, #tpu.memory_space<smem>>
    %125 = vector.broadcast %124 : f32 to vector<1x128xf32>
    %126 = arith.mulf %123, %125 : vector<1x128xf32>
    %127 = arith.addf %117, %126 : vector<1x128xf32>
    %128 = vector.extract_strided_slice %6 {offsets = [3, 0], sizes = [1, 128], strides = [1, 1]} : vector<4x128xf32> to vector<1x128xf32>
    %c3_50 = arith.constant 3 : index
    %c2_51 = arith.constant 2 : index
    %129 = memref.load %arg6[%c3_50, %c2_51] : memref<4x3xf32, #tpu.memory_space<smem>>
    %130 = vector.broadcast %129 : f32 to vector<1x128xf32>
    %131 = arith.mulf %128, %130 : vector<1x128xf32>
    %132 = arith.addf %122, %131 : vector<1x128xf32>
    %c2_52 = arith.constant 2 : index
    %133 = memref.load %arg7[%c2_52] : memref<3xf32, #tpu.memory_space<smem>>
    %134 = vector.broadcast %133 : f32 to vector<1x128xf32>
    %135 = arith.addf %127, %134 : vector<1x128xf32>
    %c2_53 = arith.constant 2 : index
    %136 = memref.load %arg8[%c2_53] : memref<3xf32, #tpu.memory_space<smem>>
    %137 = vector.broadcast %136 : f32 to vector<1x128xf32>
    %138 = arith.addf %132, %137 : vector<1x128xf32>
    %139 = tpu.concatenate %47, %91, %135 in 0 : vector<1x128xf32>, vector<1x128xf32>, vector<1x128xf32> -> vector<3x128xf32>
    %140 = tpu.concatenate %50, %94, %138 in 0 : vector<1x128xf32>, vector<1x128xf32>, vector<1x128xf32> -> vector<3x128xf32>
    %cst_54 = arith.constant 5.000000e-01 : f32
    %141 = vector.broadcast %cst_54 : f32 to vector<3x128xf32>
    %142 = arith.mulf %141, %140 : vector<3x128xf32>
    %143 = math.exp %142 : vector<3x128xf32>
    %cst_55 = arith.constant 0.000000e+00 : f32
    %144 = vector.broadcast %cst_55 : f32 to vector<3x128xf32>
    %145 = arith.subf %144, %140 : vector<3x128xf32>
    %146 = math.exp %145 : vector<3x128xf32>
    %147 = arith.mulf %143, %143 : vector<3x128xf32>
    %c0_56 = arith.constant 0 : index
    %c0_57 = arith.constant 0 : index
    %c0_58 = arith.constant 0 : index
    %148 = vector.load %arg3[%c0_56, %c0_57, %c0_58] : memref<1x3x128xf32, #tpu.memory_space<vmem>>, vector<1x3x128xf32>
    %149 = vector.shape_cast %148 : vector<1x3x128xf32> to vector<3x128xf32>
    %150 = arith.subf %149, %139 : vector<3x128xf32>
    %151 = arith.mulf %150, %150 : vector<3x128xf32>
    %cst_59 = arith.constant -5.000000e-01 : f32
    %152 = vector.broadcast %cst_59 : f32 to vector<3x128xf32>
    %153 = arith.mulf %152, %151 : vector<3x128xf32>
    %154 = arith.mulf %153, %146 : vector<3x128xf32>
    %cst_60 = arith.constant 5.000000e-01 : f32
    %155 = vector.broadcast %cst_60 : f32 to vector<3x128xf32>
    %156 = arith.mulf %155, %140 : vector<3x128xf32>
    %157 = arith.subf %154, %156 : vector<3x128xf32>
    %cst_61 = arith.constant 0.918938517 : f32
    %158 = vector.broadcast %cst_61 : f32 to vector<3x128xf32>
    %159 = arith.subf %157, %158 : vector<3x128xf32>
    %160 = vector.shape_cast %159 : vector<3x128xf32> to vector<1x3x128xf32>
    %cst_62 = arith.constant dense<0.000000e+00> : vector<1xf32>
    %161 = vector.multi_reduction <add>, %160, %cst_62 [1, 2] : vector<1x3x128xf32> to vector<1xf32>
    %162 = vector.shape_cast %161 : vector<1xf32> to vector<1x1x1xf32>
    %163 = vector.extract %162[0, 0, 0] : f32 from vector<1x1x1xf32>
    %164 = vector.broadcast %163 : f32 to vector<1x1x1xf32>
    %c0_63 = arith.constant 0 : index
    %c0_64 = arith.constant 0 : index
    %c0_65 = arith.constant 0 : index
    %165 = vector.load %arg9[%c0_63, %c0_64, %c0_65] : memref<1x1x1xf32, #tpu.memory_space<vmem>>, vector<1x1x1xf32>
    tpu.vector_store %arg9[%c0_63, %c0_64, %c0_65], %164 {strides = array<i32>} : memref<1x1x1xf32, #tpu.memory_space<vmem>>, vector<1x1x1xf32>,
    %c0_66 = arith.constant 0 : index
    %c0_67 = arith.constant 0 : index
    %c0_68 = arith.constant 0 : index
    %166 = vector.load %arg4[%c0_66, %c0_67, %c0_68] : memref<1x3x128xf32, #tpu.memory_space<vmem>>, vector<1x3x128xf32>
    %167 = vector.shape_cast %166 : vector<1x3x128xf32> to vector<3x128xf32>
    %168 = arith.mulf %143, %167 : vector<3x128xf32>
    %169 = arith.addf %139, %168 : vector<3x128xf32>
    %c0_69 = arith.constant 0 : index
    %c0_70 = arith.constant 0 : index
    %c0_71 = arith.constant 0 : index
    %170 = vector.load %arg10[%c0_69, %c0_70, %c0_71] : memref<1x3x128xf32, #tpu.memory_space<vmem>>, vector<1x3x128xf32>
    %171 = vector.shape_cast %170 : vector<1x3x128xf32> to vector<3x128xf32>
    %172 = vector.shape_cast %169 : vector<3x128xf32> to vector<1x3x128xf32>
    tpu.vector_store %arg10[%c0_69, %c0_70, %c0_71], %172 {strides = array<i32>} : memref<1x3x128xf32, #tpu.memory_space<vmem>>, vector<1x3x128xf32>,
    %c0_72 = arith.constant 0 : index
    %c0_73 = arith.constant 0 : index
    %c0_74 = arith.constant 0 : index
    %173 = vector.load %arg11[%c0_72, %c0_73, %c0_74] : memref<1x3x128xf32, #tpu.memory_space<vmem>>, vector<1x3x128xf32>
    %174 = vector.shape_cast %173 : vector<1x3x128xf32> to vector<3x128xf32>
    %175 = vector.shape_cast %139 : vector<3x128xf32> to vector<1x3x128xf32>
    tpu.vector_store %arg11[%c0_72, %c0_73, %c0_74], %175 {strides = array<i32>} : memref<1x3x128xf32, #tpu.memory_space<vmem>>, vector<1x3x128xf32>,
    %c0_75 = arith.constant 0 : index
    %c0_76 = arith.constant 0 : index
    %c0_77 = arith.constant 0 : index
    %176 = vector.load %arg12[%c0_75, %c0_76, %c0_77] : memref<1x3x128xf32, #tpu.memory_space<vmem>>, vector<1x3x128xf32>
    %177 = vector.shape_cast %176 : vector<1x3x128xf32> to vector<3x128xf32>
    %178 = vector.shape_cast %147 : vector<3x128xf32> to vector<1x3x128xf32>
    tpu.vector_store %arg12[%c0_75, %c0_76, %c0_77], %178 {strides = array<i32>} : memref<1x3x128xf32, #tpu.memory_space<vmem>>, vector<1x3x128xf32>,
    %c0_78 = arith.constant 0 : index
    %c0_79 = arith.constant 0 : index
    %c0_80 = arith.constant 0 : index
    %179 = vector.load %arg13[%c0_78, %c0_79, %c0_80] : memref<1x3x128xf32, #tpu.memory_space<vmem>>, vector<1x3x128xf32>
    %180 = vector.shape_cast %179 : vector<1x3x128xf32> to vector<3x128xf32>
    %181 = vector.shape_cast %143 : vector<3x128xf32> to vector<1x3x128xf32>
    tpu.vector_store %arg13[%c0_78, %c0_79, %c0_80], %181 {strides = array<i32>} : memref<1x3x128xf32, #tpu.memory_space<vmem>>, vector<1x3x128xf32>,
    return
  }
  func.func @transform_0(%arg0: i32, %arg1: i32) -> (i32, i32, i32) {
    %c0_i32 = arith.constant 0 : i32
    %c0_i32_0 = arith.constant 0 : i32
    return %arg0, %c0_i32, %arg1 : i32, i32, i32
  }
  func.func @transform_1(%arg0: i32, %arg1: i32) -> (i32, i32, i32) {
    %c0_i32 = arith.constant 0 : i32
    %c0_i32_0 = arith.constant 0 : i32
    return %arg0, %c0_i32, %arg1 : i32, i32, i32
  }
  func.func @transform_2(%arg0: i32, %arg1: i32) -> (i32, i32, i32) {
    %c0_i32 = arith.constant 0 : i32
    %c0_i32_0 = arith.constant 0 : i32
    return %arg0, %c0_i32, %arg1 : i32, i32, i32
  }
  func.func @transform_3(%arg0: i32, %arg1: i32) -> (i32, i32) {
    %c0_i32 = arith.constant 0 : i32
    %c0_i32_0 = arith.constant 0 : i32
    %c0_i32_1 = arith.constant 0 : i32
    return %c0_i32, %c0_i32_0 : i32, i32
  }
  func.func @transform_4(%arg0: i32, %arg1: i32) -> (i32, i32) {
    %c0_i32 = arith.constant 0 : i32
    %c0_i32_0 = arith.constant 0 : i32
    %c0_i32_1 = arith.constant 0 : i32
    return %c0_i32, %c0_i32_0 : i32, i32
  }
  func.func @transform_5(%arg0: i32, %arg1: i32) -> i32 {
    %c0_i32 = arith.constant 0 : i32
    %c0_i32_0 = arith.constant 0 : i32
    return %c0_i32 : i32
  }
  func.func @transform_6(%arg0: i32, %arg1: i32) -> i32 {
    %c0_i32 = arith.constant 0 : i32
    %c0_i32_0 = arith.constant 0 : i32
    return %c0_i32 : i32
  }
  func.func @transform_7(%arg0: i32, %arg1: i32) -> (i32, i32, i32) {
    %c2_i32 = arith.constant 2 : i32
    %0 = arith.muli %arg0, %c2_i32 : i32
    %1 = arith.addi %0, %arg1 : i32
    %c0_i32 = arith.constant 0 : i32
    %c0_i32_0 = arith.constant 0 : i32
    %c0_i32_1 = arith.constant 0 : i32
    return %1, %c0_i32, %c0_i32_0 : i32, i32, i32
  }
  func.func @transform_8(%arg0: i32, %arg1: i32) -> (i32, i32, i32) {
    %c0_i32 = arith.constant 0 : i32
    %c0_i32_0 = arith.constant 0 : i32
    return %arg0, %c0_i32, %arg1 : i32, i32, i32
  }
  func.func @transform_9(%arg0: i32, %arg1: i32) -> (i32, i32, i32) {
    %c0_i32 = arith.constant 0 : i32
    %c0_i32_0 = arith.constant 0 : i32
    return %arg0, %c0_i32, %arg1 : i32, i32, i32
  }
  func.func @transform_10(%arg0: i32, %arg1: i32) -> (i32, i32, i32) {
    %c0_i32 = arith.constant 0 : i32
    %c0_i32_0 = arith.constant 0 : i32
    return %arg0, %c0_i32, %arg1 : i32, i32, i32
  }
  func.func @transform_11(%arg0: i32, %arg1: i32) -> (i32, i32, i32) {
    %c0_i32 = arith.constant 0 : i32
    %c0_i32_0 = arith.constant 0 : i32
    return %arg0, %c0_i32, %arg1 : i32, i32, i32
  }
}

</mosaic_0001>

<bundles_post_ra>
// kernel: tpu_custom_call.1
= control target key start
LH: loop header
LB: loop body
LE: loop exit
PB: predicated region body
PF: predicated region fallthrough
CT: control target
= control target key end

     0   :  { %s1695_s0 = inlined_call_operand.vmem [shape: f32[2,4,256], index: 0, kind: input, shape index: {}]   ;;  %s1696_s1 = inlined_call_operand.vmem [shape: f32[2,3,256], index: 1, kind: input, shape index: {}]   ;;  %s1697_s2 = inlined_call_operand.vmem [shape: f32[2,3,256], index: 2, kind: input, shape index: {}]   ;;  %s1698_s3 = inlined_call_operand.vmem [shape: f32[4,3], index: 3, kind: input, shape index: {}]   ;;  %s1699_s4 = inlined_call_operand.vmem [shape: f32[4,3], index: 4, kind: input, shape index: {}]   ;;  %s1700_s5 = inlined_call_operand.vmem [shape: f32[3], index: 5, kind: input, shape index: {}]   ;;  %s1701_s6 = inlined_call_operand.vmem [shape: f32[3], index: 6, kind: input, shape index: {}]   ;;  %s1702_s7 = inlined_call_operand.vmem [shape: f32[4,1,1], index: 7, kind: output, shape index: {0}]   ;;  %s1703_s8 = inlined_call_operand.vmem [shape: f32[2,3,256], index: 8, kind: output, shape index: {1}]   ;;  %s1704_s9 = inlined_call_operand.vmem [shape: f32[2,3,256], index: 9, kind: output, shape index: {2}]   ;;  %s1705_s10 = inlined_call_operand.vmem [shape: f32[2,3,256], index: 10, kind: output, shape index: {3}]   ;;  %s1706_s11 = inlined_call_operand.vmem [shape: f32[2,3,256], index: 11, kind: output, shape index: {4}]  }
   0x1   :  { %1707 = sst [smem:[#allocation12_spill]] %s1698_s3 }
   0x2   :  { %1708 = sst [smem:[#allocation13_spill]] %s1699_s4 }
   0x3   :  { %1709 = sst [smem:[#allocation14_spill]] %s1700_s5 }
   0x4   :  { %17 = vsyncpa [#allocation3], 0 }
   0x5   :  { %18 = vsyncpa [#allocation5], 0 }
   0x6   :  { %19 = vsyncpa [#allocation8], 0  ;;  %s1488_s17 = smov 0   ;;  %s1490_s18 = smov 0  }
   0x7   :  { %s1492_s19 = smov 0   ;;  %s1494_s20 = smov 0  }
   0x8   :  { %s1496_s21 = smov 0  }
   0x9 LB: > { %s1710_s4 = sld [smem:[#allocation13_spill]]  ;;  %s1166_s25 = sadd.s32 4294967295, %s1422_s21   ;;  %s1422_s21 = sphi %s1496_s21, %s25_s21   ;;  %s1418_s20 = sphi %s1494_s20, %s1719_s20   ;;  %s1414_s19 = sphi %s1492_s19, %s1718_s19   ;;  %s1410_s18 = sphi %s1490_s18, %s1717_s18   ;;  %s1406_s17 = sphi %s1488_s17, %s1716_s17  }
   0xa   : > { %p1170_p0 = scmp.ge.s32.totalorder %s1422_s21, 1  ;;  %p352_p1 = scmp.lt.s32.totalorder %s1422_s21, 5 }
   0xb   : > { %p1519_p2 = scmp.eq.s32.totalorder %s1166_s25, 0  ;;  %s34_s29 = sadd.s32 1, %s1414_s19 }
   0xc   : > { %p1523_p3 = pnand %p1170_p0, %p352_p1  ;;  %p35_p6 = scmp.ge.s32.totalorder %s34_s29, 2 }
   0xd   : > { %s1424_s30 = smov [#allocation4]   ;;  %s37_s12 = sadd.s32 1, %s1418_s20 }
   0xe   : > { %p1243_p4 = pneg %p1523_p3  ;;  %s1721_s29 = smov (%p35_p6, %s34_s29), 0 }
   0xf   : > { %s374_s24 = sshll.u32 %s1710_s4, 4  ;;  %s1714_s3 = sld [smem:[#allocation12_spill]]  ;;  %s375_s24 = int_to_ptr.vmem [resolvable:$true] %s374_s24 }
  0x10   : > { %p1531_p5 = pnand %p1519_p2, %p1243_p4  ;;  %s1723_s12 = smov (!%p35_p6, %s37_s12), %s1418_s20 }
  0x11   : > { %p39_p7 = scmp.ge.s32.totalorder %s1723_s12, 2  ;;  %s1715_s5 = sld [smem:[#allocation14_spill]] }
  0x12   : > { %1249 = dma.vmem_to_smem (!%p1531_p5), %s375_s24, 64, %s1424_s30, [#allocation5]  }
  0x13   : > { %s1425_s25 = smov [#allocation2]   ;;  %s1725_s12 = smov (%p39_p7, %s1723_s12), 0 }
  0x14   : > { %s1426_s24 = smov [#allocation6]   ;;  %s394_s13 = sshll.u32 %s1701_s6, 4  ;;  %s395_s13 = int_to_ptr.vmem [resolvable:$true] %s394_s13 }
  0x15   : > { %s364_s15 = sshll.u32 %s1714_s3, 4  ;;  %s1427_s14 = smov [#allocation7]   ;;  %s365_s15 = int_to_ptr.vmem [resolvable:$true] %s364_s15 }
  0x16   : > { %1246 = dma.vmem_to_smem (!%p1531_p5), %s365_s15, 64, %s1425_s25, [#allocation3]  }
  0x17   : > { %s384_s23 = sshll.u32 %s1715_s5, 4  ;;  %440 = sbr.rel (%p1523_p3) target bundleno = 282 (0x11a), region = 48  ;;  %s385_s23 = int_to_ptr.vmem [resolvable:$true] %s384_s23 }
  0x18   : > { %1252 = dma.vmem_to_smem (!%p1531_p5), %s385_s23, 16, %s1426_s24, [#allocation5]  }
  0x19   : > { %1255 = dma.vmem_to_smem (!%p1531_p5), %s395_s13, 16, %s1427_s14, [#allocation8]  }
  0x1c   : > { %1393 = dma.done.wait (%p1519_p2), [#allocation3], 64  }
  0x1d   : > { %1395 = vsyncadd (%p1519_p2), [#allocation3], 4294967232 }
  0x1e   : > { %1397 = dma.done.wait (%p1519_p2), [#allocation5], 80  }
  0x1f   : > { %1399 = vsyncadd (%p1519_p2), [#allocation5], 4294967216 }
  0x20   : > { %1401 = dma.done.wait (%p1519_p2), [#allocation8], 16  }
  0x21   : > { %1403 = vsyncadd (%p1519_p2), [#allocation8], 4294967280 }
  0x22   : > { %462 = sfence }
  0x23   : > { %p548_p8 = scmp.lt.s32.totalorder %s1410_s18, 1  ;;  %p550_p9 = scmp.lt.s32.totalorder %s1406_s17, 1  ;;  %vm783_vm1 = vcmask 1040384   ;;  %vm785_vm2 = vcmask 1041408   ;;  %vm809_vm3 = vcmask 1042432   ;;  %vm821_vm4 = vcmask 0  }
  0x24   : > { %s1196_s16 = sld [smem:[#allocation2 + $0x80]] }
  0x25   : > { %s549_s4 = scalar_select %p548_p8, %s1410_s18, 1 }
  0x26   : > { %s551_s27 = scalar_select %p550_p9, %s1406_s17, 1 }
  0x27   : > { %s1181_s28 = sshll.u32 %s549_s4, 1  ;;  %s1197_s23 = sld [smem:[#allocation4 + $0x80]] }
  0x28   : > { %s553_s15 = sadd.s32 %s1181_s28, %s551_s27  ;;  %s615_s30 = sld [smem:[#allocation2]] }
  0x29   : > { %s1577_s22 = sshll.u32 %s553_s15, 2  ;;  %s618_s13 = sld [smem:[#allocation4]] }
  0x2a   : > { %s555_s26 = scalar_lea.vmem %s1695_s0, %s1577_s22  ;;  %s1198_s14 = sld [smem:[#allocation2 + $0x100]]  ;;  %v622_v2 = vstv %s1196_s16 }
  0x2b   : > { %v611_v0 = vld [vmem:[%s555_s26] sm:$0xf]  ;;  %s1199_s3 = sld [smem:[#allocation4 + $0x100]] }
  0x2c   : > { %v613_v1 = vmul.f32 0.01, %v611_v0  ;;  %vm612_vm0 = vcmp.gt.f32.partialorder %v611_v0, 0.0  ;;  %s1583_s5 = sld [smem:[#allocation2 + $0x180]] }
  0x2d   : > { %v629_v3 = vstv %s1197_s23  ;;  %s1585_s4 = sld [smem:[#allocation4 + $0x180]] }
  0x2e   : > { %v1587_v4 = vsel %vm612_vm0, %v611_v0, %v613_v1  ;;  %s1589_s27 = sld [smem:[#allocation6]]  ;;  %v616_v6 = vstv %s615_s30 }
  0x2f   : > { %v623_v5 = vmul.f32 %v622_v2, %v1587_v4  ;;  %s1592_s28 = sld [smem:[#allocation7]]  ;;  %v630_v7 = vmul.f32 %v629_v3, %v1587_v4  ;;  %v619_v8 = vstv %s618_s13  ;;  %v617_v10 = vmul.f32 %v616_v6, %v1587_v4 }
  0x30   : > { %s1202_s15 = sld [smem:[#allocation2 + $0x1]]  ;;  %v636_v9 = vstv %s1198_s14  ;;  %v620_v13 = vmul.f32 %v619_v8, %v1587_v4 }
  0x31   : > { %s1203_s16 = sld [smem:[#allocation4 + $0x1]]  ;;  %v625_v11 = vrot.slane %v623_v5, 1  ;;  %v643_v12 = vstv %s1199_s3  ;;  %v632_v14 = vrot.slane %v630_v7, 1  ;;  %v637_v15 = vmul.f32 %v636_v9, %v1587_v4 }
  0x32   : > { %s1204_s25 = sld [smem:[#allocation2 + $0x81]]  ;;  %v644_v16 = vmul.f32 %v643_v12, %v1587_v4  ;;  %v650_v17 = vstv %s1583_s5 }
  0x33   : > { %s1205_s23 = sld [smem:[#allocation4 + $0x81]]  ;;  %v627_v19 = vadd.f32 %v625_v11, %v617_v10  ;;  %v634_v21 = vadd.f32 %v632_v14, %v620_v13  ;;  %v639_v22 = vrot.slane %v637_v15, 2  ;;  %v657_v23 = vstv %s1585_s4 }
  0x34   : > { %s1206_s24 = sld [smem:[#allocation2 + $0x101]]  ;;  %v651_v25 = vmul.f32 %v650_v17, %v1587_v4  ;;  %v646_v29 = vrot.slane %v644_v16, 2  ;;  %v658_v33 = vmul.f32 %v657_v23, %v1587_v4  ;;  %v664_v56 = vstv %s1589_s27  ;;  %s602_s27 = scalar_lea.vmem %s1705_s10, %s1577_s22 }
  0x35   : > { %s1207_s26 = sld [smem:[#allocation4 + $0x101]]  ;;  %v641_v37 = vadd.f32 %v639_v22, %v627_v19 }
  0x36   : > { %v670_v18 = vstv %s1202_s15  ;;  %s1600_s30 = sld [smem:[#allocation2 + $0x181]]  ;;  %v653_v45 = vrot.slane %v651_v25, 3  ;;  %v648_v49 = vadd.f32 %v646_v29, %v634_v21  ;;  %v660_v52 = vrot.slane %v658_v33, 3 }
  0x37   : > { %v673_v20 = vstv %s1203_s16  ;;  %s1602_s13 = sld [smem:[#allocation4 + $0x181]]  ;;  %v671_v26 = vmul.f32 %v670_v18, %v1587_v4 }
  0x38   : > { %v676_v24 = vstv %s1204_s25  ;;  %s1605_s3 = sld [smem:[#allocation6 + $0x1]]  ;;  %v674_v30 = vmul.f32 %v673_v20, %v1587_v4  ;;  %v655_v59 = vadd.f32 %v653_v45, %v641_v37  ;;  %v662_v3 = vadd.f32 %v660_v52, %v648_v49 }
  0x39   : > { %v677_v27 = vmul.f32 %v676_v24, %v1587_v4  ;;  %v683_v28 = vstv %s1205_s23  ;;  %s1610_s5 = sld [smem:[#allocation7 + $0x1]]  ;;  %v667_v20 = vstv %s1592_s28 }
  0x3a   : > { %v684_v31 = vmul.f32 %v683_v28, %v1587_v4  ;;  %v690_v32 = vstv %s1206_s24  ;;  %s1614_s14 = sld [smem:[#allocation2 + $0x2]]  ;;  %v665_v24 = vadd.f32 %v664_v56, %v655_v59 }
  0x3b   : > { %v679_v34 = vrot.slane %v677_v27, 1  ;;  %v691_v35 = vmul.f32 %v690_v32, %v1587_v4  ;;  %v697_v36 = vstv %s1207_s26  ;;  %s1618_s4 = sld [smem:[#allocation4 + $0x2]] }
  0x3c   : > { %v686_v38 = vrot.slane %v684_v31, 1  ;;  %v698_v39 = vmul.f32 %v697_v36, %v1587_v4  ;;  %v704_v40 = vstv %s1600_s30  ;;  %s1622_s15 = sld [smem:[#allocation2 + $0x82]]  ;;  %v668_v31 = vadd.f32 %v667_v20, %v662_v3 }
  0x3d   : > { %v681_v41 = vadd.f32 %v679_v34, %v671_v26  ;;  %v693_v42 = vrot.slane %v691_v35, 2  ;;  %v705_v43 = vmul.f32 %v704_v40, %v1587_v4  ;;  %v711_v44 = vstv %s1602_s13  ;;  %s1626_s16 = sld [smem:[#allocation4 + $0x82]] }
  0x3e   : > { %v688_v46 = vadd.f32 %v686_v38, %v674_v30  ;;  %v700_v47 = vrot.slane %v698_v39, 2  ;;  %v712_v48 = vmul.f32 %v711_v44, %v1587_v4  ;;  %s1216_s25 = sld [smem:[#allocation2 + $0x102]]  ;;  %v718_v61 = vstv %s1605_s3  ;;  %s563_s3 = scalar_lea.vmem %s1696_s1, %s1577_s22 }
  0x3f   : > { %v695_v50 = vadd.f32 %v693_v42, %v681_v41  ;;  %v707_v51 = vrot.slane %v705_v43, 3  ;;  %s1217_s23 = sld [smem:[#allocation4 + $0x102]]  ;;  %v721_v63 = vstv %s1610_s5  ;;  %v802_v41 = vld [vmem:[%s563_s3] sm:$0x7]  ;;  %s586_s5 = scalar_lea.vmem %s1703_s8, %s1577_s22 }
  0x40   : > { %v702_v53 = vadd.f32 %v700_v47, %v688_v46  ;;  %v714_v54 = vrot.slane %v712_v48, 3  ;;  %v724_v55 = vstv %s1614_s14  ;;  %s1218_s24 = sld [smem:[#allocation2 + $0x182]] }
  0x41   : > { %v709_v57 = vadd.f32 %v707_v51, %v695_v50  ;;  %v727_v58 = vstv %s1618_s4  ;;  %s1219_s26 = sld [smem:[#allocation4 + $0x182]]  ;;  %v725_v0 = vmul.f32 %v724_v55, %v1587_v4  ;;  %s594_s4 = scalar_lea.vmem %s1704_s9, %s1577_s22 }
  0x42   : > { %v716_v60 = vadd.f32 %v714_v54, %v702_v53  ;;  %v730_v62 = vstv %s1622_s15  ;;  %s1634_s30 = sld [smem:[#allocation6 + $0x2]]  ;;  %v728_v5 = vmul.f32 %v727_v58, %v1587_v4 }
  0x43   : > { %v731_v1 = vmul.f32 %v730_v62, %v1587_v4  ;;  %v737_v2 = vstv %s1626_s16  ;;  %s1640_s13 = sld [smem:[#allocation7 + $0x2]]  ;;  %v719_v8 = vadd.f32 %v718_v61, %v709_v57 }
  0x44   : > { %v738_v6 = vmul.f32 %v737_v2, %v1587_v4  ;;  %v744_v7 = vstv %s1216_s25  ;;  %v722_v12 = vadd.f32 %v721_v63, %v716_v60  ;;  %s571_s25 = scalar_lea.vmem %s1697_s2, %s1577_s22 }
  0x45   : > { %v733_v9 = vrot.slane %v731_v1, 1  ;;  %v745_v10 = vmul.f32 %v744_v7, %v1587_v4  ;;  %v751_v11 = vstv %s1217_s23  ;;  %v778_v30 = vrot.slane %v719_v8, 7  ;;  %v823_v51 = vld [vmem:[%s571_s25] sm:$0x7] }
  0x46   : > { %v740_v13 = vrot.slane %v738_v6, 1  ;;  %v752_v14 = vmul.f32 %v751_v11, %v1587_v4  ;;  %v758_v15 = vstv %s1218_s24  ;;  %v788_v34 = vrot.slane %v722_v12, 7 }
  0x47   : > { %v735_v16 = vadd.f32 %v733_v9, %v725_v0  ;;  %v747_v17 = vrot.slane %v745_v10, 2  ;;  %v759_v18 = vmul.f32 %v758_v15, %v1587_v4  ;;  %v765_v19 = vstv %s1219_s26  ;;  %s610_s26 = scalar_lea.vmem %s1706_s11, %s1577_s22  ;;  %s1187_s22 = sshll.u32 %s1410_s18, 1 }
  0x48   : > { %v742_v21 = vadd.f32 %v740_v13, %v728_v5  ;;  %v754_v22 = vrot.slane %v752_v14, 2  ;;  %v766_v23 = vmul.f32 %v765_v19, %v1587_v4  ;;  %v772_v29 = vstv %s1634_s30  ;;  %s573_s14 = sadd.s32 %s1406_s17, %s1187_s22 }
  0x49   : > { %v749_v25 = vadd.f32 %v747_v17, %v735_v16  ;;  %v761_v26 = vrot.slane %v759_v18, 3  ;;  %v775_v33 = vstv %s1640_s13  ;;  %v784_v37 = vsel %vm783_vm1, %v665_v24, %v778_v30  ;;  %p574_p10 = scmp.lt.s32.totalorder %s573_s14, 3 }
  0x4a   : > { %v756_v27 = vadd.f32 %v754_v22, %v742_v21  ;;  %v768_v28 = vrot.slane %v766_v23, 3  ;;  %v793_v39 = vsel %vm783_vm1, %v668_v31, %v788_v34 }
  0x4b   : > { %v763_v32 = vadd.f32 %v761_v26, %v749_v25  ;;  %s1727_s14 = smov (!%p574_p10, %s573_s14), 3 }
  0x4c   : > { %v770_v35 = vadd.f32 %v768_v28, %v756_v27  ;;  %s576_s16 = scalar_lea.vmem %s1702_s7, %s1727_s14 }
  0x4d   : > { %v773_v36 = vadd.f32 %v772_v29, %v763_v32 }
  0x4e   : > { %v776_v4 = vadd.f32 %v775_v33, %v770_v35 }
  0x4f   : > { %v781_v38 = vrot.slane %v773_v36, 6 }
  0x50   : > { %v791_v40 = vrot.slane %v776_v4, 6 }
  0x51   : > { %v786_v42 = vsel %vm785_vm2, %v784_v37, %v781_v38 }
  0x52   : > { %v794_v43 = vsel %vm785_vm2, %v793_v39, %v791_v40  ;;  %827 = vst [vmem:[%s594_s4] sm:$0x7] %v786_v42  ;;  %v803_v46 = vsub.f32 %v802_v41, %v786_v42 }
  0x53   : > { %v795_v44 = vmul.f32 0.5, %v794_v43  ;;  %v798_v45 = vsub.f32 0.0, %v794_v43 }
  0x54   : > { %v804_v49 = vmul.f32 %v803_v46, %v803_v46 }
  0x55   : > { %v796_v47 = vmul.f32 1.442695, %v795_v44  ;;  %v799_v48 = vmul.f32 1.442695, %v798_v45 }
  0x56   : > { %v805_v50 = vmul.f32 -0.5, %v804_v49 }
  0x57   : > { %1308 = vpow2.f32 %v796_v47 }
  0x58   : > { %1310 = vpow2.f32 %v799_v48 }
  0x5d   : > { %v1309_v52 = vpop.eup %1308 }
  0x5e   : > { %v1311_v53 = vpop.eup %1310  ;;  %v801_v54 = vmul.f32 %v1309_v52, %v1309_v52  ;;  %v824_v55 = vmul.f32 %v1309_v52, %v823_v51  ;;  %829 = vst [vmem:[%s610_s26] sm:$0x7] %v1309_v52 }
  0x5f   : > { %v806_v56 = vmul.f32 %v1311_v53, %v805_v50 }
  0x60   : > { %v825_v57 = vadd.f32 %v824_v55, %v786_v42  ;;  %828 = vst [vmem:[%s602_s27] sm:$0x7] %v801_v54 }
  0x61   : > { %v807_v58 = vsub.f32 %v806_v56, %v795_v44 }
  0x62   : > { %826 = vst [vmem:[%s586_s5] sm:$0x7] %v825_v57 }
  0x63   : > { %v1222_v59 = vadd.f32 -0.9189385, %v807_v58 }
  0x65   : > { %v810_v60 = vsel %vm809_vm3, %v1222_v59, 0.0 }
  0x66   : > { %811 = vadd.xlane.f32.xlu0 %v810_v60 }
  0xd9   : > { %v812_v61 = vpop.xlane.xlu0 %811 }
  0xda   : > { %v813_v62 = vrot.slane %v812_v61, 4 }
  0xdc   : > { %v814_v63 = vadd.f32 %v813_v62, %v812_v61 }
  0xde   : > { %v815_v0 = vrot.slane %v814_v63, 2 }
  0xe0   : > { %v816_v1 = vadd.f32 %v815_v0, %v814_v63 }
  0xe2   : > { %v817_v2 = vrot.slane %v816_v1, 1 }
  0xe4   : > { %v818_v3 = vadd.f32 %v817_v2, %v816_v1 }
  0xe6   : > { %1225 = vpush %v818_v3 }
 0x117   : > { %s1226_s25 = spop %1225 }
 0x118   : > { %v820_v5 = vstv %s1226_s25 }
 0x119   : > { %822 = vst.msk [vmem:[%s576_s16] sm:$0x1] %vm821_vm4, %v820_v5 }
 0x11a PF: > { %s25_s21 = sadd.s32 1, %s1422_s21   ;;  %s1716_s17 = smov %s1414_s19 }
 0x11b   : > { %p22_p11 = scmp.ge.s32.totalorder %s25_s21, 6   ;;  %s1717_s18 = smov %s1418_s20 }
 0x11c   : > { %s1718_s19 = smov %s1721_s29  ;;  %s1719_s20 = smov %s1725_s12 }
 0x11d   :  { %24 = sbr.rel (!%p22_p11) target bundleno = 9 (0x9), region = 149 }
 0x122   :  { %941 = vsyncpa [#allocation3], 1 }
 0x123   :  { %943 = vsyncpa [#allocation3 + $0x1], 1 }
 0x124   :  { %944 = vsyncpa [#allocation5], 1 }
 0x125   :  { %945 = vsyncpa [#allocation8], 1 }

</bundles_post_ra>
